<compile_context>
chip_gen: v6e
topology: v6e:2x2x1
jax: 0.10.0
libtpu: 0.0.40
codegen_flags: <defaults>
</compile_context>

<pallas_src>
import functools

import jax
import jax.numpy as jnp
from jax.experimental import pallas as pl
from jax.experimental.pallas import tpu as pltpu

_LN_EPS = 1e-5
_LANE = 128


def _round_up(x, m):
    return ((x + m - 1) // m) * m


def _pad2d(x, rows, cols):
    r, c = x.shape
    return jnp.pad(x, ((0, rows - r), (0, cols - c)))


# ----------------------------- kernel bodies ----------------------------------

def _transform_kernel(x_ref, w_ref, o_ref, *, cdtype):
    """HW = X @ W for one row tile of X (W fully resident)."""
    o_ref[...] = jnp.dot(
        x_ref[...].astype(cdtype), w_ref[...],
        preferred_element_type=jnp.float32).astype(o_ref.dtype)


def _aggregate_kernel(a_ref, hw_ref, b_ref, g_ref, be_ref, o_ref, acc_ref,
                      *, apply_relu_ln, hidden):
    """Y = A_hat @ HW + b, optionally followed by ReLU + (masked) LayerNorm.

    grid = (row tiles, K tiles); K is the reduction axis (last, 'arbitrary').
    The f32 accumulator lives in VMEM scratch; the lane-dense [tm, H_pad]
    output block is written once, on the final K step.
    """
    k = pl.program_id(1)

    @pl.when(k == 0)
    def _():
        acc_ref[...] = jnp.zeros_like(acc_ref)

    acc_ref[...] += jnp.dot(a_ref[...], hw_ref[...],
                            preferred_element_type=jnp.float32)

    @pl.when(k == pl.num_programs(1) - 1)
    def _():
        h = acc_ref[...] + b_ref[...]
        if apply_relu_ln:
            h = jnp.maximum(h, 0.0)               # ReLU (Dropout = id in eval)
            # LayerNorm over the *real* hidden lanes only; padded lanes are 0
            # on input and stay 0 on output because gamma/beta are 0-padded.
            lane = jax.lax.broadcasted_iota(jnp.int32, h.shape, 1)
            mask = (lane < hidden).astype(jnp.float32)
            inv_n = 1.0 / float(hidden)
            mu = jnp.sum(h * mask, axis=-1, keepdims=True) * inv_n
            d = h - mu
            var = jnp.sum(d * d * mask, axis=-1, keepdims=True) * inv_n
            h = d * jax.lax.rsqrt(var + _LN_EPS) * g_ref[...] + be_ref[...]
        o_ref[...] = h.astype(o_ref.dtype)


def _post_mp_kernel(emb_ref, pw1_ref, pb1_ref, pw2_ref, pb2_ref, o_ref,
                    *, out_dim, cdtype):
    """post_mp: ReLU -> Linear -> (Dropout eval id) -> Linear -> log_softmax."""
    h = jnp.maximum(emb_ref[...].astype(jnp.float32), 0.0)
    h = jnp.dot(h.astype(cdtype), pw1_ref[...],
                preferred_element_type=jnp.float32) + pb1_ref[...]
    h = jnp.dot(h.astype(cdtype), pw2_ref[...],
                preferred_element_type=jnp.float32) + pb2_ref[...]
    # log_softmax over the real output classes only (padded lanes masked out).
    lane = jax.lax.broadcasted_iota(jnp.int32, h.shape, 1)
    valid = lane < out_dim
    hm = jnp.where(valid, h, -1e30)
    m = jnp.max(hm, axis=-1, keepdims=True)
    ez = jnp.exp(hm - m)                           # padded lanes -> 0
    lse = jnp.log(jnp.sum(ez, axis=-1, keepdims=True))
    o_ref[...] = h - m - lse                       # padded lanes sliced off outside


# ----------------------------- pallas_call wrappers ----------------------------

def _transform(x, w, *, tm, cdtype):
    n_pad, f_pad = x.shape
    h_pad = w.shape[1]
    return pl.pallas_call(
        functools.partial(_transform_kernel, cdtype=cdtype),
        out_shape=jax.ShapeDtypeStruct((n_pad, h_pad), cdtype),
        grid_spec=pltpu.PrefetchScalarGridSpec(
            num_scalar_prefetch=0,
            grid=(n_pad // tm,),
            in_specs=[
                pl.BlockSpec((tm, f_pad), lambda i: (i, 0)),
                pl.BlockSpec((f_pad, h_pad), lambda i: (0, 0)),
            ],
            out_specs=pl.BlockSpec((tm, h_pad), lambda i: (i, 0)),
        ),
        compiler_params=pltpu.CompilerParams(dimension_semantics=("parallel",)),
    )(x, w)


def _aggregate(a, hw, b, g, be, *, apply_relu_ln, hidden, out_dtype, tm, tk):
    n_pad = a.shape[0]
    h_pad = hw.shape[1]
    return pl.pallas_call(
        functools.partial(_aggregate_kernel, apply_relu_ln=apply_relu_ln,
                          hidden=hidden),
        out_shape=jax.ShapeDtypeStruct((n_pad, h_pad), out_dtype),
        grid_spec=pltpu.PrefetchScalarGridSpec(
            num_scalar_prefetch=0,
            grid=(n_pad // tm, n_pad // tk),
            in_specs=[
                pl.BlockSpec((tm, tk), lambda i, k: (i, k)),
                pl.BlockSpec((tk, h_pad), lambda i, k: (k, 0)),
                pl.BlockSpec((1, h_pad), lambda i, k: (0, 0)),
                pl.BlockSpec((1, h_pad), lambda i, k: (0, 0)),
                pl.BlockSpec((1, h_pad), lambda i, k: (0, 0)),
            ],
            out_specs=pl.BlockSpec((tm, h_pad), lambda i, k: (i, 0)),
            scratch_shapes=[pltpu.VMEM((tm, h_pad), jnp.float32)],
        ),
        compiler_params=pltpu.CompilerParams(
            dimension_semantics=("parallel", "arbitrary")),
    )(a, hw, b, g, be)


def _post_mp(emb, pw1, pb1, pw2, pb2, *, out_dim, tm, cdtype):
    n_pad, h_pad = emb.shape
    o_pad = pw2.shape[1]
    return pl.pallas_call(
        functools.partial(_post_mp_kernel, out_dim=out_dim, cdtype=cdtype),
        out_shape=jax.ShapeDtypeStruct((n_pad, o_pad), jnp.float32),
        grid_spec=pltpu.PrefetchScalarGridSpec(
            num_scalar_prefetch=0,
            grid=(n_pad // tm,),
            in_specs=[
                pl.BlockSpec((tm, h_pad), lambda i: (i, 0)),
                pl.BlockSpec((h_pad, h_pad), lambda i: (0, 0)),
                pl.BlockSpec((1, h_pad), lambda i: (0, 0)),
                pl.BlockSpec((h_pad, o_pad), lambda i: (0, 0)),
                pl.BlockSpec((1, o_pad), lambda i: (0, 0)),
            ],
            out_specs=pl.BlockSpec((tm, o_pad), lambda i: (i, 0)),
        ),
        compiler_params=pltpu.CompilerParams(dimension_semantics=("parallel",)),
    )(emb, pw1, pb1, pw2, pb2)


# ----------------------------- forward / glue ---------------------------------

def gnn_stack_forward(a_hat, x, params, *, matmul_dtype=jnp.float32,
                      tm=None, tk=None):
    """GNNStack forward (task='node', eval mode): returns (emb, log_softmax).

    matmul_dtype=jnp.bfloat16 casts the MXU operands (A_hat / activations /
    weights) to bf16 (recommended on v6e/v7x); accumulation and all elementwise
    epilogues (bias, ReLU, LayerNorm, log_softmax) remain f32.
    """
    n, in_dim = x.shape
    hidden = params["w1"].shape[1]
    out_dim = params["pw2"].shape[1]

    n_pad = _round_up(n, _LANE)
    f_pad = _round_up(in_dim, _LANE)
    h_pad = _round_up(hidden, _LANE)
    o_pad = _round_up(out_dim, _LANE)

    # Row / reduction tile sizes for the A_hat aggregation.  128 keeps every
    # block (8,128)-aligned and inside the default scoped VMEM even on v7x's
    # 64 MiB core; use 256 when N allows (bigger tiles amortize grid overhead).
    if tm is None:
        tm = 256 if n_pad % 256 == 0 else 128
    if tk is None:
        tk = 256 if n_pad % 256 == 0 else 128

    cdt = matmul_dtype

    a_p = _pad2d(a_hat.astype(jnp.float32), n_pad, n_pad).astype(cdt)
    h = _pad2d(x.astype(jnp.float32), n_pad, f_pad)

    ws = [_pad2d(params["w1"], f_pad, h_pad).astype(cdt),
          _pad2d(params["w2"], h_pad, h_pad).astype(cdt),
          _pad2d(params["w3"], h_pad, h_pad).astype(cdt)]
    bs = [_pad2d(params["b1"], 1, h_pad),
          _pad2d(params["b2"], 1, h_pad),
          _pad2d(params["b3"], 1, h_pad)]
    gs = [_pad2d(params["ln1_g"], 1, h_pad), _pad2d(params["ln2_g"], 1, h_pad)]
    bes = [_pad2d(params["ln1_b"], 1, h_pad), _pad2d(params["ln2_b"], 1, h_pad)]
    zeros_h = jnp.zeros((1, h_pad), jnp.float32)

    pw1 = _pad2d(params["pw1"], h_pad, h_pad).astype(cdt)
    pb1 = _pad2d(params["pb1"], 1, h_pad)
    pw2 = _pad2d(params["pw2"], h_pad, o_pad).astype(cdt)
    pb2 = _pad2d(params["pb2"], 1, o_pad)

    # Three GCN layers: HW = H @ W, then A_hat @ HW + b with fused ReLU+LN
    # epilogue on layers 0,1.  Layer 2's (pre-ReLU) output is emb.
    for layer in range(3):
        hw = _transform(h, ws[layer], tm=tm, cdtype=cdt)
        last = layer == 2
        h = _aggregate(
            a_p, hw, bs[layer],
            gs[layer] if not last else zeros_h,
            bes[layer] if not last else zeros_h,
            apply_relu_ln=not last, hidden=hidden,
            out_dtype=jnp.float32 if last else cdt,
            tm=tm, tk=tk)

    emb_p = h                                               # [n_pad, h_pad] f32
    out_p = _post_mp(emb_p, pw1, pb1, pw2, pb2,
                     out_dim=out_dim, tm=tm, cdtype=cdt)

    return emb_p[:n, :hidden], out_p[:n, :out_dim]


def build_normalized_adjacency(edge_index, num_nodes):
    """Dense GCN adjacency D^{-1/2} (A + I) D^{-1/2} (undirected, self-loops).

    Diagonal is clamped to 1 so pre-existing self-loop edges don't double.
    """
    src, dst = edge_index
    adj = jnp.zeros((num_nodes, num_nodes), jnp.float32)
    adj = adj.at[src, dst].set(1.0)
    adj = adj.at[dst, src].set(1.0)
    adj = jnp.clip(adj + jnp.eye(num_nodes, dtype=jnp.float32), 0.0, 1.0)
    deg = jnp.sum(adj, axis=1)
    dinv = jnp.where(deg > 0, 1.0 / jnp.sqrt(deg), 0.0)
    return adj * dinv[:, None] * dinv[None, :]


def init_params(key, in_dim, hidden_dim, out_dim):
    ks = jax.random.split(key, 8)

    def glorot(k, shape):
        fan_in, fan_out = shape
        lim = jnp.sqrt(6.0 / (fan_in + fan_out))
        return jax.random.uniform(k, shape, jnp.float32, -lim, lim)

    return {
        "w1": glorot(ks[0], (in_dim, hidden_dim)), "b1": jnp.zeros((1, hidden_dim), jnp.float32),
        "w2": glorot(ks[1], (hidden_dim, hidden_dim)), "b2": jnp.zeros((1, hidden_dim), jnp.float32),
        "w3": glorot(ks[2], (hidden_dim, hidden_dim)), "b3": jnp.zeros((1, hidden_dim), jnp.float32),
        "ln1_g": jnp.ones((1, hidden_dim), jnp.float32), "ln1_b": jnp.zeros((1, hidden_dim), jnp.float32),
        "ln2_g": jnp.ones((1, hidden_dim), jnp.float32), "ln2_b": jnp.zeros((1, hidden_dim), jnp.float32),
        "pw1": glorot(ks[3], (hidden_dim, hidden_dim)),
        "pb1": 0.01 * jax.random.normal(ks[4], (1, hidden_dim), jnp.float32),
        "pw2": glorot(ks[5], (hidden_dim, out_dim)),
        "pb2": 0.01 * jax.random.normal(ks[6], (1, out_dim), jnp.float32),
    }


# Pure-JAX reference for correctness checking (high-precision dots).
def _mm(a, b):
    return jnp.dot(a, b, precision=jax.lax.Precision.HIGHEST)


def reference_forward(a_hat, x, p):
    def ln(h, g, b):
        mu = h.mean(-1, keepdims=True)
        var = ((h - mu) ** 2).mean(-1, keepdims=True)
        return (h - mu) * jax.lax.rsqrt(var + _LN_EPS) * g + b

    h = _mm(a_hat, _mm(x, p["w1"])) + p["b1"]
    h = ln(jax.nn.relu(h), p["ln1_g"], p["ln1_b"])
    h = _mm(a_hat, _mm(h, p["w2"])) + p["b2"]
    h = ln(jax.nn.relu(h), p["ln2_g"], p["ln2_b"])
    h = _mm(a_hat, _mm(h, p["w3"])) + p["b3"]
    emb = h
    h = jax.nn.relu(h)
    h = _mm(h, p["pw1"]) + p["pb1"]
    h = _mm(h, p["pw2"]) + p["pb2"]
    return emb, jax.nn.log_softmax(h, axis=1)


if __name__ == "__main__":
    key = jax.random.PRNGKey(0)
    k_x, k_p, k_x2, k_e2, k_p2 = jax.random.split(key, 5)

    # --- Test 1: tiny graph (16 nodes, 8 feats, hidden 32, 4 classes), f32 ----
    num_nodes, in_dim, hidden_dim, out_dim = 16, 8, 32, 4
    x = jax.random.normal(k_x, (num_nodes, in_dim), jnp.float32)
    src = jnp.arange(num_nodes, dtype=jnp.int32)
    dst = (src + 1) % num_nodes
    chords_src = jnp.array([0, 3, 5, 8, 11], jnp.int32)
    chords_dst = jnp.array([7, 12, 14, 2, 6], jnp.int32)
    edge_index = (jnp.concatenate([src, chords_src]),
                  jnp.concatenate([dst, chords_dst]))
    a_hat = build_normalized_adjacency(edge_index, num_nodes)
    params = init_params(k_p, in_dim, hidden_dim, out_dim)

    emb, logp = gnn_stack_forward(a_hat, x, params, matmul_dtype=jnp.float32)
    jax.block_until_ready((emb, logp))
    emb_ref, logp_ref = reference_forward(a_hat, x, params)
    assert emb.shape == (num_nodes, hidden_dim)
    assert logp.shape == (num_nodes, out_dim)
    assert jnp.allclose(emb, emb_ref, atol=1e-3, rtol=1e-3)
    assert jnp.allclose(logp, logp_ref, atol=1e-3, rtol=1e-3)

    # --- Test 2: larger graph exercising the (row, K) tiled grid, f32 --------
    n2, f2, h2, o2 = 300, 48, 32, 7
    x2 = jax.random.normal(k_x2, (n2, f2), jnp.float32)
    n_edges = 1200
    e_src = jax.random.randint(k_e2, (n_edges,), 0, n2, jnp.int32)
    e_dst = jax.random.randint(jax.random.fold_in(k_e2, 1), (n_edges,), 0, n2, jnp.int32)
    a_hat2 = build_normalized_adjacency((e_src, e_dst), n2)
    params2 = init_params(k_p2, f2, h2, o2)

    emb2, logp2 = gnn_stack_forward(a_hat2, x2, params2, matmul_dtype=jnp.float32)
    jax.block_until_ready((emb2, logp2))
    emb2_ref, logp2_ref = reference_forward(a_hat2, x2, params2)
    assert emb2.shape == (n2, h2) and logp2.shape == (n2, o2)
    assert jnp.allclose(emb2, emb2_ref, atol=1e-3, rtol=1e-3)
    assert jnp.allclose(logp2, logp2_ref, atol=1e-3, rtol=1e-3)

    # --- Test 3: bf16 matmul-operand path (v6e/v7x recommendation), smoke ----
    emb3, logp3 = gnn_stack_forward(a_hat2, x2, params2, matmul_dtype=jnp.bfloat16)
    jax.block_until_ready((emb3, logp3))
    assert bool(jnp.all(jnp.isfinite(emb3))) and bool(jnp.all(jnp.isfinite(logp3)))
    # coarse agreement check only (bf16 operands, f32 accumulation)
    assert float(jnp.max(jnp.abs(emb3 - emb2_ref))) < 0.75
    assert float(jnp.max(jnp.abs(logp3 - logp2_ref))) < 0.75

    print("KERNEL_OK")
</pallas_src>

<mosaic_0001>
module attributes {stable_mosaic.version = 11 : i64} {
  func.func @_transform_kernel(%arg0: i32, %arg1: memref<128x128xf32, #tpu.memory_space<vmem>>, %arg2: memref<128x128xf32, #tpu.memory_space<vmem>>, %arg3: memref<128x128xf32, #tpu.memory_space<vmem>>) attributes {dimension_semantics = [#tpu.dimension_semantics<parallel>], iteration_bounds = array<i64: 1>, scalar_prefetch = 0 : i64, scratch_operands = 0 : i64, tpu.core_type = #tpu.core_type<tc>, window_params = [{transform_indices = @transform_0, window_bounds = array<i64: 128, 128>}, {pipeline_mode = #tpu.pipeline_mode<synchronous>, transform_indices = @transform_1, window_bounds = array<i64: 128, 128>}, {transform_indices = @transform_2, window_bounds = array<i64: 128, 128>}]} {
    %c0 = arith.constant 0 : index
    %c0_0 = arith.constant 0 : index
    %0 = vector.load %arg1[%c0, %c0_0] : memref<128x128xf32, #tpu.memory_space<vmem>>, vector<128x128xf32>
    %c0_1 = arith.constant 0 : index
    %c0_2 = arith.constant 0 : index
    %1 = vector.load %arg2[%c0_1, %c0_2] : memref<128x128xf32, #tpu.memory_space<vmem>>, vector<128x128xf32>
    %cst = arith.constant dense<0.000000e+00> : vector<128x128xf32>
    %2 = tpu.matmul %0, %1, %cst {dimension_numbers = #tpu.dot_dimension_numbers<[1], [0], [0], [1], [0, 0, 1, 1], [], []>} : vector<128x128xf32>, vector<128x128xf32>, vector<128x128xf32> -> vector<128x128xf32>
    %c0_3 = arith.constant 0 : index
    %c0_4 = arith.constant 0 : index
    %3 = vector.load %arg3[%c0_3, %c0_4] : memref<128x128xf32, #tpu.memory_space<vmem>>, vector<128x128xf32>
    tpu.vector_store %arg3[%c0_3, %c0_4], %2 {strides = array<i32>} : memref<128x128xf32, #tpu.memory_space<vmem>>, vector<128x128xf32>,
    return
  }
  func.func @transform_0(%arg0: i32) -> (i32, i32) {
    %c0_i32 = arith.constant 0 : i32
    %c0_i32_0 = arith.constant 0 : i32
    return %arg0, %c0_i32 : i32, i32
  }
  func.func @transform_1(%arg0: i32) -> (i32, i32) {
    %c0_i32 = arith.constant 0 : i32
    %c0_i32_0 = arith.constant 0 : i32
    %c0_i32_1 = arith.constant 0 : i32
    return %c0_i32, %c0_i32_0 : i32, i32
  }
  func.func @transform_2(%arg0: i32) -> (i32, i32) {
    %c0_i32 = arith.constant 0 : i32
    %c0_i32_0 = arith.constant 0 : i32
    return %arg0, %c0_i32 : i32, i32
  }
}

</mosaic_0001>

<bundles_post_ra>
// kernel: tpu_custom_call.1
= control target key start
LH: loop header
LB: loop body
LE: loop exit
PB: predicated region body
PF: predicated region fallthrough
CT: control target
= control target key end

     0   :  { %7 = vsyncpa [#allocation3], 0  ;;  %s480_s0 = inlined_call_operand.hbm [shape: f32[128,128], index: 0, kind: input, shape index: {}]   ;;  %s481_s1 = inlined_call_operand.hbm [shape: f32[128,128], index: 1, kind: input, shape index: {}]   ;;  %s482_s2 = inlined_call_operand.hbm [shape: f32[128,128], index: 2, kind: output, shape index: {}]  }
   0x1   :  { %8 = vsyncpa [#allocation6], 0 }
   0x2   :  { %9 = vsyncpa [#allocation4], 0  ;;  %s442_s9 = smov [#allocation2]  }
   0x3   :  { %s15_s10 = sshll.u32 %s442_s9, 4  ;;  %s16_s10 = int_to_ptr.vmem [resolvable:$true] %s15_s10 }
   0x4   :  { %s384_s11 = scalar_lea.vmem %s16_s10, 2048  ;;  %p389_p1 = scmp.lt.s32.totalorder %s16_s10, %s16_s10 }
   0x5   :  { %p385_p0 = scmp.ne.s32.totalorder %s16_s10, %s384_s11  ;;  %p390_p2 = scmp.lt.s32.totalorder %s384_s11, %s384_s11 }
   0x7   :  { %p391_p3 = por %p390_p2, %p389_p1 }
   0x9   :  { %p392_p4 = pnand %p391_p3, %p385_p0 }
   0xb   :  { %395 = shalt.err (!%p392_p4)
}
   0xc   :  { %s443_s12 = smov 128   ;;  %s444_s13 = smov 8  }
   0xd   :  { %21 = dma.hbm_to_vmem [thread:$0]  %s480_s0, 2048, %s16_s10, [#allocation3], %s443_s12, %s443_s12, %s444_s13  }
   0xe   :  { %s445_s16 = smov [#allocation5]  }
   0xf   :  { %s27_s17 = sshll.u32 %s445_s16, 4  ;;  %s28_s17 = int_to_ptr.vmem [resolvable:$true] %s27_s17 }
  0x10   :  { %s404_s18 = scalar_lea.vmem %s28_s17, 2048  ;;  %p409_p6 = scmp.lt.s32.totalorder %s28_s17, %s28_s17 }
  0x11   :  { %p405_p5 = scmp.ne.s32.totalorder %s28_s17, %s404_s18  ;;  %p410_p7 = scmp.lt.s32.totalorder %s404_s18, %s404_s18 }
  0x13   :  { %p411_p8 = por %p410_p7, %p409_p6 }
  0x15   :  { %p412_p9 = pnand %p411_p8, %p405_p5 }
  0x17   :  { %415 = shalt.err (!%p412_p9)
}
  0x18   :  { %33 = dma.hbm_to_vmem [thread:$0]  %s481_s1, 2048, %s28_s17, [#allocation6], %s443_s12, %s443_s12, %s444_s13  }
  0x19   :  { %436 = dma.done.wait [#allocation3], 2048  }
  0x1a   :  { %437 = vsyncadd [#allocation3], 4294965248 }
  0x1b   :  { %438 = dma.done.wait [#allocation6], 2048  }
  0x1c   :  { %439 = vsyncadd [#allocation6], 4294965248  ;;  %v71_v0 = vld [vmem:[#allocation5 + $0x78] sm:$0xff]  ;;  %v70_v1 = vld [vmem:[#allocation5 + $0x70] sm:$0xff]  ;;  %s446_s0 = smov [#allocation7]  }
  0x1d   :  { %283 = vmatprep.subr.mxu0 %v71_v0  ;;  %339 = vmatprep.subr.mxu1 %v71_v0  ;;  %v69_v2 = vld [vmem:[#allocation5 + $0x68] sm:$0xff]  ;;  %v68_v3 = vld [vmem:[#allocation5 + $0x60] sm:$0xff]  ;;  %v67_v4 = vld [vmem:[#allocation5 + $0x58] sm:$0xff]  ;;  %s238_s1 = sshll.u32 %s446_s0, 4  ;;  %s239_s1 = int_to_ptr.vmem [resolvable:$true] %s238_s1 }
  0x1e   :  { %284 = vmatpush3.msra.mxu0 %v71_v0  ;;  %355 = vmatpush3.msra.mxu1 %v71_v0  ;;  %v66_v5 = vld [vmem:[#allocation5 + $0x50] sm:$0xff]  ;;  %v65_v6 = vld [vmem:[#allocation5 + $0x48] sm:$0xff]  ;;  %v64_v7 = vld [vmem:[#allocation5 + $0x40] sm:$0xff]  ;;  %s416_s21 = scalar_lea.vmem %s239_s1, 2048  ;;  %p421_p11 = scmp.lt.s32.totalorder %s239_s1, %s239_s1 }
  0x1f   :  { %285 = vmatprep.subr.mxu0 %v70_v1  ;;  %340 = vmatprep.subr.mxu1 %v70_v1  ;;  %v63_v8 = vld [vmem:[#allocation5 + $0x38] sm:$0xff]  ;;  %v62_v9 = vld [vmem:[#allocation5 + $0x30] sm:$0xff]  ;;  %v61_v10 = vld [vmem:[#allocation5 + $0x28] sm:$0xff]  ;;  %p417_p10 = scmp.ne.s32.totalorder %s239_s1, %s416_s21  ;;  %p422_p12 = scmp.lt.s32.totalorder %s416_s21, %s416_s21 }
  0x20   :  { %286 = vmatpush3.msra.mxu0 %v70_v1  ;;  %356 = vmatpush3.msra.mxu1 %v70_v1  ;;  %v60_v11 = vld [vmem:[#allocation5 + $0x20] sm:$0xff]  ;;  %v59_v12 = vld [vmem:[#allocation5 + $0x18] sm:$0xff]  ;;  %v58_v13 = vld [vmem:[#allocation5 + $0x10] sm:$0xff] }
  0x21   :  { %287 = vmatprep.subr.mxu0 %v69_v2  ;;  %341 = vmatprep.subr.mxu1 %v69_v2  ;;  %v57_v14 = vld [vmem:[#allocation5 + $0x8] sm:$0xff]  ;;  %v56_v15 = vld [vmem:[#allocation5] sm:$0xff]  ;;  %v42_v20 = vld [vmem:[#allocation2 + $0x10] sm:$0xff]  ;;  %p423_p13 = por %p422_p12, %p421_p11 }
  0x22   :  { %288 = vmatpush3.msra.mxu0 %v69_v2  ;;  %357 = vmatpush3.msra.mxu1 %v69_v2  ;;  %v40_v16 = vld [vmem:[#allocation2] sm:$0xff]  ;;  %v41_v18 = vld [vmem:[#allocation2 + $0x8] sm:$0xff]  ;;  %v50_v21 = vld [vmem:[#allocation2 + $0x50] sm:$0xff] }
  0x23   :  { %289 = vmatprep.subr.mxu0 %v68_v3  ;;  %342 = vmatprep.subr.mxu1 %v68_v3  ;;  %v48_v17 = vld [vmem:[#allocation2 + $0x40] sm:$0xff]  ;;  %v49_v19 = vld [vmem:[#allocation2 + $0x48] sm:$0xff]  ;;  %v43_v22 = vld [vmem:[#allocation2 + $0x18] sm:$0xff]  ;;  %p424_p0 = pnand %p423_p13, %p417_p10 }
  0x24   :  { %290 = vmatpush3.msra.mxu0 %v68_v3  ;;  %358 = vmatpush3.msra.mxu1 %v68_v3  ;;  %v51_v23 = vld [vmem:[#allocation2 + $0x58] sm:$0xff]  ;;  %v44_v24 = vld [vmem:[#allocation2 + $0x20] sm:$0xff]  ;;  %v45_v26 = vld [vmem:[#allocation2 + $0x28] sm:$0xff] }
  0x25   :  { %291 = vmatprep.subr.mxu0 %v67_v4  ;;  %343 = vmatprep.subr.mxu1 %v67_v4  ;;  %v52_v25 = vld [vmem:[#allocation2 + $0x60] sm:$0xff]  ;;  %v53_v27 = vld [vmem:[#allocation2 + $0x68] sm:$0xff]  ;;  %v46_v28 = vld [vmem:[#allocation2 + $0x30] sm:$0xff] }
  0x26   :  { %292 = vmatpush3.msra.mxu0 %v67_v4  ;;  %359 = vmatpush3.msra.mxu1 %v67_v4  ;;  %v54_v29 = vld [vmem:[#allocation2 + $0x70] sm:$0xff]  ;;  %v47_v30 = vld [vmem:[#allocation2 + $0x38] sm:$0xff] }
  0x27   :  { %293 = vmatprep.subr.mxu0 %v66_v5  ;;  %344 = vmatprep.subr.mxu1 %v66_v5  ;;  %v55_v31 = vld [vmem:[#allocation2 + $0x78] sm:$0xff] }
  0x28   :  { %294 = vmatpush3.msra.mxu0 %v66_v5  ;;  %360 = vmatpush3.msra.mxu1 %v66_v5 }
  0x29   :  { %295 = vmatprep.subr.mxu0 %v65_v6  ;;  %345 = vmatprep.subr.mxu1 %v65_v6 }
  0x2a   :  { %296 = vmatpush3.msra.mxu0 %v65_v6  ;;  %361 = vmatpush3.msra.mxu1 %v65_v6 }
  0x2b   :  { %297 = vmatprep.subr.mxu0 %v64_v7  ;;  %346 = vmatprep.subr.mxu1 %v64_v7 }
  0x2c   :  { %298 = vmatpush3.msra.mxu0 %v64_v7  ;;  %362 = vmatpush3.msra.mxu1 %v64_v7 }
  0x2d   :  { %299 = vmatprep.subr.mxu0 %v63_v8  ;;  %347 = vmatprep.subr.mxu1 %v63_v8 }
  0x2e   :  { %300 = vmatpush3.msra.mxu0 %v63_v8  ;;  %363 = vmatpush3.msra.mxu1 %v63_v8 }
  0x2f   :  { %301 = vmatprep.subr.mxu0 %v62_v9  ;;  %348 = vmatprep.subr.mxu1 %v62_v9 }
  0x30   :  { %302 = vmatpush3.msra.mxu0 %v62_v9  ;;  %364 = vmatpush3.msra.mxu1 %v62_v9 }
  0x31   :  { %303 = vmatprep.subr.mxu0 %v61_v10  ;;  %349 = vmatprep.subr.mxu1 %v61_v10 }
  0x32   :  { %304 = vmatpush3.msra.mxu0 %v61_v10  ;;  %365 = vmatpush3.msra.mxu1 %v61_v10 }
  0x33   :  { %305 = vmatprep.subr.mxu0 %v60_v11  ;;  %350 = vmatprep.subr.mxu1 %v60_v11 }
  0x34   :  { %306 = vmatpush3.msra.mxu0 %v60_v11  ;;  %366 = vmatpush3.msra.mxu1 %v60_v11 }
  0x35   :  { %307 = vmatprep.subr.mxu0 %v59_v12  ;;  %351 = vmatprep.subr.mxu1 %v59_v12 }
  0x36   :  { %308 = vmatpush3.msra.mxu0 %v59_v12  ;;  %367 = vmatpush3.msra.mxu1 %v59_v12 }
  0x37   :  { %309 = vmatprep.subr.mxu0 %v58_v13  ;;  %352 = vmatprep.subr.mxu1 %v58_v13 }
  0x38   :  { %310 = vmatpush3.msra.mxu0 %v58_v13  ;;  %368 = vmatpush3.msra.mxu1 %v58_v13 }
  0x39   :  { %311 = vmatprep.subr.mxu0 %v57_v14  ;;  %353 = vmatprep.subr.mxu1 %v57_v14 }
  0x3a   :  { %312 = vmatpush3.msra.mxu0 %v57_v14  ;;  %369 = vmatpush3.msra.mxu1 %v57_v14 }
  0x3b   :  { %313 = vmatprep.subr.mxu0 %v56_v15  ;;  %354 = vmatprep.subr.mxu1 %v56_v15 }
  0x3c   :  { %314 = vmatpush3.msra.mxu0 %v56_v15  ;;  %370 = vmatpush3.msra.mxu1 %v56_v15 }
  0x3d   :  { %315 = vmatprep.mubr.f32.mxu0 %v40_v16  ;;  %327 = vmatprep.mubr.f32.mxu1 %v48_v17 }
  0x3e   :  { %316 = vmatmul.mubr.f32.vlgmr.msra.gmra.mxu0 %v41_v18  ;;  %328 = vmatmul.mubr.f32.vlgmr.msra.gmra.mxu1 %v49_v19 }
  0x3f   :  { %318 = vmatprep.mubr.f32.mxu0 %v42_v20  ;;  %330 = vmatprep.mubr.f32.mxu1 %v50_v21 }
  0x42   :  { %319 = vmatmul.mubr.f32.gmra.mxu0 %v43_v22  ;;  %331 = vmatmul.mubr.f32.gmra.mxu1 %v51_v23 }
  0x43   :  { %321 = vmatprep.mubr.f32.mxu0 %v44_v24  ;;  %333 = vmatprep.mubr.f32.mxu1 %v52_v25 }
  0x46   :  { %322 = vmatmul.mubr.f32.gmra.mxu0 %v45_v26  ;;  %334 = vmatmul.mubr.f32.gmra.mxu1 %v53_v27 }
  0x47   :  { %324 = vmatprep.mubr.f32.mxu0 %v46_v28  ;;  %336 = vmatprep.mubr.f32.mxu1 %v54_v29 }
  0x4a   :  { %325 = vmatmul.mubr.f32.gmra.mxu0 %v47_v30  ;;  %337 = vmatmul.mubr.f32.gmra.mxu1 %v55_v31 }
  0xfe   :  { %v317_v32 = vpop.f32.mrf.mxu0  ;;  %v329_v33 = vpop.f32.mrf.mxu1 }
  0xff   :  { %218 = vst [vmem:[#allocation7 + $0x8] sm:$0xff] %v317_v32  ;;  %226 = vst [vmem:[#allocation7 + $0x48] sm:$0xff] %v329_v33 }
 0x100   :  { %v138_v34 = vpop.f32.mrf.mxu0  ;;  %v178_v35 = vpop.f32.mrf.mxu1 }
 0x101   :  { %217 = vst [vmem:[#allocation7] sm:$0xff] %v138_v34  ;;  %225 = vst [vmem:[#allocation7 + $0x40] sm:$0xff] %v178_v35 }
 0x102   :  { %v320_v36 = vpop.f32.mrf.mxu0  ;;  %v332_v37 = vpop.f32.mrf.mxu1 }
 0x103   :  { %220 = vst [vmem:[#allocation7 + $0x18] sm:$0xff] %v320_v36  ;;  %228 = vst [vmem:[#allocation7 + $0x58] sm:$0xff] %v332_v37 }
 0x104   :  { %v148_v38 = vpop.f32.mrf.mxu0  ;;  %v188_v39 = vpop.f32.mrf.mxu1 }
 0x105   :  { %219 = vst [vmem:[#allocation7 + $0x10] sm:$0xff] %v148_v38  ;;  %227 = vst [vmem:[#allocation7 + $0x50] sm:$0xff] %v188_v39 }
 0x106   :  { %v323_v40 = vpop.f32.mrf.mxu0  ;;  %v335_v41 = vpop.f32.mrf.mxu1 }
 0x107   :  { %222 = vst [vmem:[#allocation7 + $0x28] sm:$0xff] %v323_v40  ;;  %230 = vst [vmem:[#allocation7 + $0x68] sm:$0xff] %v335_v41 }
 0x108   :  { %v158_v42 = vpop.f32.mrf.mxu0  ;;  %v198_v43 = vpop.f32.mrf.mxu1 }
 0x109   :  { %221 = vst [vmem:[#allocation7 + $0x20] sm:$0xff] %v158_v42  ;;  %229 = vst [vmem:[#allocation7 + $0x60] sm:$0xff] %v198_v43 }
 0x10a   :  { %v326_v44 = vpop.f32.mrf.mxu0  ;;  %v338_v45 = vpop.f32.mrf.mxu1 }
 0x10b   :  { %224 = vst [vmem:[#allocation7 + $0x38] sm:$0xff] %v326_v44  ;;  %232 = vst [vmem:[#allocation7 + $0x78] sm:$0xff] %v338_v45 }
 0x10c   :  { %v168_v46 = vpop.f32.mrf.mxu0  ;;  %v208_v47 = vpop.f32.mrf.mxu1 }
 0x10d   :  { %223 = vst [vmem:[#allocation7 + $0x30] sm:$0xff] %v168_v46  ;;  %231 = vst [vmem:[#allocation7 + $0x70] sm:$0xff] %v208_v47 }
 0x10e   :  { %427 = shalt.err (!%p424_p0)
}
 0x10f   :  { %244 = dma.vmem_to_hbm [thread:$0]  %s239_s1, 2048, %s482_s2, [#allocation4], %s443_s12, %s443_s12, %s444_s13  }
 0x110   :  { %440 = dma.done.wait [#allocation4], 2048  }
 0x111   :  { %441 = vsyncadd [#allocation4], 4294965248 }
 0x112   :  { %248 = vsyncpa [#allocation3], 1 }
 0x113   :  { %249 = vsyncpa [#allocation6], 1 }
 0x114   :  { %250 = vsyncpa [#allocation4], 1 }

</bundles_post_ra>
